<compile_context>
chip_gen: v7x
topology: tpu7x:2x2x1
jax: 0.10.0
libtpu: 0.0.40
codegen_flags: <defaults>
</compile_context>

<pallas_src>
from functools import partial

import jax
import jax.numpy as jnp
import numpy as np
from jax.experimental import pallas as pl
from jax.experimental.pallas import tpu as pltpu


# ----------------------------- quant helpers (plain JAX glue) -----------------

def fake_quant_weight_per_channel(w, bit_width=8, out_axis=-1):
    """CommonIntWeightPerChannelQuant: symmetric narrow-range int8, per out-ch."""
    qmax = 2.0 ** (bit_width - 1) - 1.0          # narrow range: [-127, 127]
    axes = tuple(i for i in range(w.ndim) if i != (out_axis % w.ndim))
    scale = jnp.max(jnp.abs(w), axis=axes, keepdims=True) / qmax
    scale = jnp.maximum(scale, 1e-8)
    return jnp.clip(jnp.round(w / scale), -qmax, qmax) * scale


def bn_fold(gamma, beta, mean, var, eps):
    scale = gamma / jnp.sqrt(var + eps)
    shift = beta - mean * scale
    return scale, shift


# ----------------------------- Pallas kernel ----------------------------------

def _inv_residual_kernel(x_ref, mw_ref, a1_ref, b1_ref, wcol_ref, b2_ref, sc_ref,
                         out_ref, *, width, chans):
    # x_ref:    (R, HW) f32; R = B*C rows on the sublane axis (multiple of 8),
    #           HW = H*W on the lane axis (multiple of 128) -> fully dense vregs.
    # mw_ref:   (9, R, HW)   pre-masked depthwise tap weights (border mask folded in).
    # a1_ref:   (R, 1)       bn1_scale * inv_s_act  (per row).
    # b1_ref:   (R, 1)       bn1_shift * inv_s_act.
    # wcol_ref: (2C-1, R, 1) pointwise weights per sublane shift, with
    #           s_act * bn2_scale * inv_s_id folded in; zero where a shift would
    #           cross an image boundary.
    # b2_ref:   (R, 1)       bn2_shift * inv_s_id.
    # sc_ref:   (2,) SMEM    [inv_s_id, s_id].
    R, HW = x_ref.shape
    W = width
    C = chans
    inv_s_id = sc_ref[0]
    s_id = sc_ref[1]

    x = x_ref[...]                                  # (R, HW), lane/sublane dense

    # ---- depthwise 3x3, stride 1, zero-pad 1: 9 lane rolls (XLU) x pre-masked
    #      full-width tap weights (VPU).  No selects, no iota, no broadcasts.
    acc = jnp.zeros((R, HW), jnp.float32)
    t = 0
    for dy in (-1, 0, 1):
        for dx in (-1, 0, 1):
            off = dy * W + dx
            shifted = pltpu.roll(x, (-off) % HW, axis=1) if off else x
            acc = acc + shifted * mw_ref[t]
            t += 1

    # ---- BN1 + quantized ReLU (uint8); inv_s_act pre-folded into a1/b1 and the
    #      clip-at-0 subsumes the ReLU.  q holds the integer-valued codes 0..255.
    q = jnp.clip(jnp.round(acc * a1_ref[...] + b1_ref[...]), 0.0, 255.0)

    # ---- 1x1 pointwise + BN2 + int8 quant, full-width.  Channel mixing is done
    #      with 2C-1 sublane rolls (XLU) + FMAs (VPU); per-shift weights are zero
    #      wherever the roll wraps across an image, so wrapped rows contribute 0.
    # TODO(synk): at real MobileNetV2 widths (hidden up to 960, oup up to 320)
    # replace this unrolled roll/FMA form with a K-tiled jnp.dot on the MXU with
    # the pointwise weights in VMEM.
    z = jnp.zeros((R, HW), jnp.float32)
    for s in range(-(C - 1), C):
        qs = pltpu.roll(q, (-s) % R, axis=0) if s else q
        z = z + qs * wcol_ref[s + C - 1]
    z = z + b2_ref[...]

    # ---- shared int8 QuantIdentity on both branches + residual add; rescale by
    #      s_id once on the summed integer codes (hoisted out of any per-row loop).
    zq = jnp.clip(jnp.round(z), -128.0, 127.0)
    xq = jnp.clip(jnp.round(x * inv_s_id), -128.0, 127.0)
    out_ref[...] = ((xq + zq) * s_id).astype(out_ref.dtype)


# ----------------------------- wrapper -----------------------------------------

def quant_inverted_residual(x_nchw, params):
    """x_nchw: (B, C, H, W) float32 -> (B, C, H, W) float32 (stride=1 block)."""
    B, C, H, W = x_nchw.shape
    HW = H * W
    R = B * C
    Co = params["wpw_q"].shape[1]
    assert Co == C, "residual block requires inp == oup"
    assert R % 8 == 0 and HW % 128 == 0, "toy shapes chosen (8,128)-tile aligned"

    # NCHW -> (B*C, H*W): free row-major collapse (B,C adjacent; H,W adjacent).
    x_flat = x_nchw.reshape(R, HW).astype(jnp.float32)

    s_act = params["s_act"][0]
    inv_s_act = params["inv_s_act"][0]
    s_id = params["s_id"][0]
    inv_s_id = params["inv_s_id"][0]

    # ---- pre-masked depthwise tap weights: one (R, HW) plane per tap so the
    #      kernel's depthwise body is a single roll + FMA per tap.
    pos = jnp.arange(HW, dtype=jnp.int32)
    hh = pos // W
    ww = pos - hh * W
    planes = []
    for dy in (-1, 0, 1):
        for dx in (-1, 0, 1):
            valid = ((hh + dy >= 0) & (hh + dy < H) &
                     (ww + dx >= 0) & (ww + dx < W)).astype(jnp.float32)     # (HW,)
            w_row = jnp.tile(params["wdw_q"][dy + 1, dx + 1, :], B)           # (R,)
            planes.append(w_row[:, None] * valid[None, :])
    mw = jnp.stack(planes, axis=0)                                            # (9,R,HW)

    # ---- BN1 folded with the uint8 activation-quant scale.
    a1 = jnp.tile(params["bn1_scale"] * inv_s_act, B)[:, None]                # (R,1)
    b1 = jnp.tile(params["bn1_shift"] * inv_s_act, B)[:, None]                # (R,1)

    # ---- pointwise weights folded with s_act, BN2 scale and the int8 identity-
    #      quant scale, laid out per sublane shift for the roll-based 1x1 conv:
    #      wcol[s+C-1][b*C+co] = wfold[co+s, co] if 0 <= co+s < C else 0.
    wfold = params["wpw_q"] * s_act * (params["bn2_scale"] * inv_s_id)[None, :]
    co_idx = jnp.arange(C)
    cols = []
    for s in range(-(C - 1), C):
        c_idx = co_idx + s
        w_s = jnp.where((c_idx >= 0) & (c_idx < C),
                        wfold[jnp.clip(c_idx, 0, C - 1), co_idx], 0.0)        # (Co,)
        cols.append(jnp.tile(w_s, B)[:, None])                                # (R,1)
    wcol = jnp.stack(cols, axis=0)                                            # (2C-1,R,1)

    b2 = jnp.tile(params["bn2_shift"] * inv_s_id, B)[:, None]                 # (R,1)
    scalars = jnp.stack([inv_s_id, s_id]).astype(jnp.float32)                 # (2,)

    flops = R * HW * (2 * 9 + 4 + 2 * (2 * C - 1) + 8)
    bytes_accessed = 4 * (2 * R * HW + 9 * R * HW + (2 * C + 3) * R + 2)

    # Single grid step: the whole fused (B*C, HW) block is a few KB, so splitting
    # across grid steps / TensorCores would cost more (per-step overhead, masked
    # stores) than it saves.
    # TODO(synk): when scaling to real MobileNetV2 widths, split the grid over the
    # folded B*C axis in sublane-aligned multiples (>=2 steps for DMA overlap on
    # v5e/v6e, a "parallel" axis for v7x's 2 TCs), re-derive tile sizes against
    # v7x's 64 MiB VMEM, and fuse consecutive inverted-residual blocks into one
    # pallas_call to avoid intermediate HBM round-trips.
    out_flat = pl.pallas_call(
        partial(_inv_residual_kernel, width=W, chans=C),
        grid=(1,),
        in_specs=[
            pl.BlockSpec((R, HW), lambda i: (0, 0)),
            pl.BlockSpec((9, R, HW), lambda i: (0, 0, 0)),
            pl.BlockSpec((R, 1), lambda i: (0, 0)),
            pl.BlockSpec((R, 1), lambda i: (0, 0)),
            pl.BlockSpec((2 * C - 1, R, 1), lambda i: (0, 0, 0)),
            pl.BlockSpec((R, 1), lambda i: (0, 0)),
            pl.BlockSpec(memory_space=pltpu.MemorySpace.SMEM),   # [inv_s_id, s_id]
        ],
        out_specs=pl.BlockSpec((R, HW), lambda i: (0, 0)),
        out_shape=jax.ShapeDtypeStruct((R, HW), jnp.float32),
        compiler_params=pltpu.CompilerParams(dimension_semantics=("arbitrary",)),
        cost_estimate=pl.CostEstimate(flops=flops, transcendentals=0,
                                      bytes_accessed=bytes_accessed),
    )(x_flat, mw, a1, b1, wcol, b2, scalars)

    return out_flat.reshape(B, C, H, W)


# ----------------------------- pure-JAX reference ------------------------------
# Written op-by-op in the module's original (unfolded) form, with the same tap and
# channel accumulation order as the kernel.

def reference(x_nchw, params):
    B, C, H, W = x_nchw.shape
    Co = params["wpw_q"].shape[1]
    x = x_nchw.astype(jnp.float32)
    wdw = params["wdw_q"]                                           # (3, 3, C)

    xp = jnp.pad(x, ((0, 0), (0, 0), (1, 1), (1, 1)))
    acc = jnp.zeros_like(x)
    for dy in (-1, 0, 1):
        for dx in (-1, 0, 1):
            patch = xp[:, :, 1 + dy:1 + dy + H, 1 + dx:1 + dx + W]
            acc = acc + patch * wdw[dy + 1, dx + 1, :][None, :, None, None]

    y = acc * params["bn1_scale"][None, :, None, None] + params["bn1_shift"][None, :, None, None]
    y = jnp.maximum(y, 0.0)
    s_act = params["s_act"][0]
    y = jnp.clip(jnp.round(y * params["inv_s_act"][0]), 0.0, 255.0) * s_act

    zs = []
    for co in range(Co):
        z = y[:, 0] * params["wpw_q"][0, co]
        for c in range(1, C):
            z = z + y[:, c] * params["wpw_q"][c, co]
        zs.append(z)
    z = jnp.stack(zs, axis=1)
    z = z * params["bn2_scale"][None, :, None, None] + params["bn2_shift"][None, :, None, None]

    s_id = params["s_id"][0]
    inv_s_id = params["inv_s_id"][0]
    zq = jnp.clip(jnp.round(z * inv_s_id), -128.0, 127.0) * s_id
    xq = jnp.clip(jnp.round(x * inv_s_id), -128.0, 127.0) * s_id
    return xq + zq


# ----------------------------- main ---------------------------------------------

if __name__ == "__main__":
    # Block config: inp = oup = 4, stride = 1, expand_ratio = 1 -> hidden = 4
    B, C, H, W = 2, 4, 16, 16
    hidden, oup = C, C
    bn_eps = 1e-5

    key = jax.random.PRNGKey(0)
    ks = jax.random.split(key, 12)

    x = jax.random.normal(ks[0], (B, C, H, W), jnp.float32)

    # Depthwise 3x3 weights (PyTorch (hidden,1,3,3) -> layout (3,3,hidden))
    w_dw = jax.random.normal(ks[1], (3, 3, hidden), jnp.float32) * 0.5
    # Pointwise 1x1 weights (PyTorch (oup,hidden,1,1) -> layout (hidden,oup))
    w_pw = jax.random.normal(ks[2], (hidden, oup), jnp.float32) * 0.5

    # Eval-mode BatchNorm parameters (deterministic synthetic init)
    g1 = 1.0 + 0.1 * jax.random.normal(ks[3], (hidden,), jnp.float32)
    b1 = 0.1 * jax.random.normal(ks[4], (hidden,), jnp.float32)
    m1 = 0.1 * jax.random.normal(ks[5], (hidden,), jnp.float32)
    v1 = jnp.abs(jax.random.normal(ks[6], (hidden,), jnp.float32)) + 0.5
    g2 = 1.0 + 0.1 * jax.random.normal(ks[7], (oup,), jnp.float32)
    b2 = 0.1 * jax.random.normal(ks[8], (oup,), jnp.float32)
    m2 = 0.1 * jax.random.normal(ks[9], (oup,), jnp.float32)
    v2 = jnp.abs(jax.random.normal(ks[10], (oup,), jnp.float32)) + 0.5

    bn1_scale, bn1_shift = bn_fold(g1, b1, m1, v1, bn_eps)
    bn2_scale, bn2_shift = bn_fold(g2, b2, m2, v2, bn_eps)

    # TODO(synk): Brevitas learned activation scales (parameter-from-stats) have no
    # static equivalent; modeled as fixed per-tensor scales clamped at 2e-5.
    s_act = jnp.maximum(jnp.array([6.0 / 255.0], jnp.float32), 2e-5)  # uint8 ReLU quant
    s_id = jnp.maximum(jnp.array([6.0 / 127.0], jnp.float32), 2e-5)   # int8 identity quant

    params = dict(
        wdw_q=fake_quant_weight_per_channel(w_dw, out_axis=-1),
        wpw_q=fake_quant_weight_per_channel(w_pw, out_axis=-1),
        bn1_scale=bn1_scale, bn1_shift=bn1_shift,
        bn2_scale=bn2_scale, bn2_shift=bn2_shift,
        s_act=s_act, inv_s_act=1.0 / s_act,
        s_id=s_id, inv_s_id=1.0 / s_id,
    )

    out = jax.block_until_ready(quant_inverted_residual(x, params))
    ref = jax.block_until_ready(reference(x, params))

    assert out.shape == (B, C, H, W), out.shape
    diff = np.abs(np.asarray(out) - np.asarray(ref))
    lsb = float(s_id[0])
    # Outputs are fake-quantized: elements match the reference bitwise except for
    # very rare rounding-boundary flips caused by the review-requested algebraic
    # scale folding / FMA re-association.  A stage-1 (QReLU) flip can propagate
    # through a pointwise weight of magnitude > 1 and move the final int8 code by
    # up to 2 LSBs; anything beyond that, or more than ~1% of elements differing
    # at all, indicates a real bug.
    assert diff.max() <= 2.5 * lsb + 1e-4, f"max diff {diff.max()}"
    assert float((diff > 1e-3).mean()) < 0.01, f"mismatch frac {(diff > 1e-3).mean()}"
    print("KERNEL_OK")
</pallas_src>

<mosaic_0001>
module attributes {stable_mosaic.version = 11 : i64} {
  func.func @_inv_residual_kernel(%arg0: i32, %arg1: memref<8x256xf32, #tpu.memory_space<vmem>>, %arg2: memref<9x8x256xf32, #tpu.memory_space<vmem>>, %arg3: memref<8x1xf32, #tpu.memory_space<vmem>>, %arg4: memref<8x1xf32, #tpu.memory_space<vmem>>, %arg5: memref<7x8x1xf32, #tpu.memory_space<vmem>>, %arg6: memref<8x1xf32, #tpu.memory_space<vmem>>, %arg7: memref<2xf32, #tpu.memory_space<smem>>, %arg8: memref<8x256xf32, #tpu.memory_space<vmem>>) attributes {dimension_semantics = [#tpu.dimension_semantics<arbitrary>], iteration_bounds = array<i64: 1>, scalar_prefetch = 0 : i64, scratch_operands = 0 : i64, tpu.core_type = #tpu.core_type<tc>, window_params = [{pipeline_mode = #tpu.pipeline_mode<synchronous>, transform_indices = @transform_0, window_bounds = array<i64: 8, 256>}, {pipeline_mode = #tpu.pipeline_mode<synchronous>, transform_indices = @transform_1, window_bounds = array<i64: 9, 8, 256>}, {pipeline_mode = #tpu.pipeline_mode<synchronous>, transform_indices = @transform_2, window_bounds = array<i64: 8, 1>}, {pipeline_mode = #tpu.pipeline_mode<synchronous>, transform_indices = @transform_3, window_bounds = array<i64: 8, 1>}, {pipeline_mode = #tpu.pipeline_mode<synchronous>, transform_indices = @transform_4, window_bounds = array<i64: 7, 8, 1>}, {pipeline_mode = #tpu.pipeline_mode<synchronous>, transform_indices = @transform_5, window_bounds = array<i64: 8, 1>}, {transform_indices = @transform_6, window_bounds = array<i64: 2>}, {pipeline_mode = #tpu.pipeline_mode<synchronous>, transform_indices = @transform_7, window_bounds = array<i64: 8, 256>}]} {
    %c0 = arith.constant 0 : index
    %0 = memref.load %arg7[%c0] : memref<2xf32, #tpu.memory_space<smem>>
    %c1 = arith.constant 1 : index
    %1 = memref.load %arg7[%c1] : memref<2xf32, #tpu.memory_space<smem>>
    %c0_0 = arith.constant 0 : index
    %c0_1 = arith.constant 0 : index
    %2 = vector.load %arg1[%c0_0, %c0_1] : memref<8x256xf32, #tpu.memory_space<vmem>>, vector<8x256xf32>
    %cst = arith.constant 0.000000e+00 : f32
    %3 = vector.broadcast %cst : f32 to vector<8x256xf32>
    %c17_i32 = arith.constant 17 : i32
    %4 = tpu.dynamic_rotate %2 by %c17_i32 dim 1 : vector<8x256xf32>, i32 -> vector<8x256xf32>
    %c0_2 = arith.constant 0 : index
    %c0_3 = arith.constant 0 : index
    %c0_4 = arith.constant 0 : index
    %5 = vector.load %arg2[%c0_2, %c0_3, %c0_4] : memref<9x8x256xf32, #tpu.memory_space<vmem>>, vector<1x8x256xf32>
    %6 = vector.shape_cast %5 : vector<1x8x256xf32> to vector<8x256xf32>
    %7 = arith.mulf %4, %6 : vector<8x256xf32>
    %8 = arith.addf %3, %7 : vector<8x256xf32>
    %c16_i32 = arith.constant 16 : i32
    %9 = tpu.dynamic_rotate %2 by %c16_i32 dim 1 : vector<8x256xf32>, i32 -> vector<8x256xf32>
    %c1_5 = arith.constant 1 : index
    %c0_6 = arith.constant 0 : index
    %c0_7 = arith.constant 0 : index
    %10 = vector.load %arg2[%c1_5, %c0_6, %c0_7] : memref<9x8x256xf32, #tpu.memory_space<vmem>>, vector<1x8x256xf32>
    %11 = vector.shape_cast %10 : vector<1x8x256xf32> to vector<8x256xf32>
    %12 = arith.mulf %9, %11 : vector<8x256xf32>
    %13 = arith.addf %8, %12 : vector<8x256xf32>
    %c15_i32 = arith.constant 15 : i32
    %14 = tpu.dynamic_rotate %2 by %c15_i32 dim 1 : vector<8x256xf32>, i32 -> vector<8x256xf32>
    %c2 = arith.constant 2 : index
    %c0_8 = arith.constant 0 : index
    %c0_9 = arith.constant 0 : index
    %15 = vector.load %arg2[%c2, %c0_8, %c0_9] : memref<9x8x256xf32, #tpu.memory_space<vmem>>, vector<1x8x256xf32>
    %16 = vector.shape_cast %15 : vector<1x8x256xf32> to vector<8x256xf32>
    %17 = arith.mulf %14, %16 : vector<8x256xf32>
    %18 = arith.addf %13, %17 : vector<8x256xf32>
    %c1_i32 = arith.constant 1 : i32
    %19 = tpu.dynamic_rotate %2 by %c1_i32 dim 1 : vector<8x256xf32>, i32 -> vector<8x256xf32>
    %c3 = arith.constant 3 : index
    %c0_10 = arith.constant 0 : index
    %c0_11 = arith.constant 0 : index
    %20 = vector.load %arg2[%c3, %c0_10, %c0_11] : memref<9x8x256xf32, #tpu.memory_space<vmem>>, vector<1x8x256xf32>
    %21 = vector.shape_cast %20 : vector<1x8x256xf32> to vector<8x256xf32>
    %22 = arith.mulf %19, %21 : vector<8x256xf32>
    %23 = arith.addf %18, %22 : vector<8x256xf32>
    %c4 = arith.constant 4 : index
    %c0_12 = arith.constant 0 : index
    %c0_13 = arith.constant 0 : index
    %24 = vector.load %arg2[%c4, %c0_12, %c0_13] : memref<9x8x256xf32, #tpu.memory_space<vmem>>, vector<1x8x256xf32>
    %25 = vector.shape_cast %24 : vector<1x8x256xf32> to vector<8x256xf32>
    %26 = arith.mulf %2, %25 : vector<8x256xf32>
    %27 = arith.addf %23, %26 : vector<8x256xf32>
    %c255_i32 = arith.constant 255 : i32
    %28 = tpu.dynamic_rotate %2 by %c255_i32 dim 1 : vector<8x256xf32>, i32 -> vector<8x256xf32>
    %c5 = arith.constant 5 : index
    %c0_14 = arith.constant 0 : index
    %c0_15 = arith.constant 0 : index
    %29 = vector.load %arg2[%c5, %c0_14, %c0_15] : memref<9x8x256xf32, #tpu.memory_space<vmem>>, vector<1x8x256xf32>
    %30 = vector.shape_cast %29 : vector<1x8x256xf32> to vector<8x256xf32>
    %31 = arith.mulf %28, %30 : vector<8x256xf32>
    %32 = arith.addf %27, %31 : vector<8x256xf32>
    %c241_i32 = arith.constant 241 : i32
    %33 = tpu.dynamic_rotate %2 by %c241_i32 dim 1 : vector<8x256xf32>, i32 -> vector<8x256xf32>
    %c6 = arith.constant 6 : index
    %c0_16 = arith.constant 0 : index
    %c0_17 = arith.constant 0 : index
    %34 = vector.load %arg2[%c6, %c0_16, %c0_17] : memref<9x8x256xf32, #tpu.memory_space<vmem>>, vector<1x8x256xf32>
    %35 = vector.shape_cast %34 : vector<1x8x256xf32> to vector<8x256xf32>
    %36 = arith.mulf %33, %35 : vector<8x256xf32>
    %37 = arith.addf %32, %36 : vector<8x256xf32>
    %c240_i32 = arith.constant 240 : i32
    %38 = tpu.dynamic_rotate %2 by %c240_i32 dim 1 : vector<8x256xf32>, i32 -> vector<8x256xf32>
    %c7 = arith.constant 7 : index
    %c0_18 = arith.constant 0 : index
    %c0_19 = arith.constant 0 : index
    %39 = vector.load %arg2[%c7, %c0_18, %c0_19] : memref<9x8x256xf32, #tpu.memory_space<vmem>>, vector<1x8x256xf32>
    %40 = vector.shape_cast %39 : vector<1x8x256xf32> to vector<8x256xf32>
    %41 = arith.mulf %38, %40 : vector<8x256xf32>
    %42 = arith.addf %37, %41 : vector<8x256xf32>
    %c239_i32 = arith.constant 239 : i32
    %43 = tpu.dynamic_rotate %2 by %c239_i32 dim 1 : vector<8x256xf32>, i32 -> vector<8x256xf32>
    %c8 = arith.constant 8 : index
    %c0_20 = arith.constant 0 : index
    %c0_21 = arith.constant 0 : index
    %44 = vector.load %arg2[%c8, %c0_20, %c0_21] : memref<9x8x256xf32, #tpu.memory_space<vmem>>, vector<1x8x256xf32>
    %45 = vector.shape_cast %44 : vector<1x8x256xf32> to vector<8x256xf32>
    %46 = arith.mulf %43, %45 : vector<8x256xf32>
    %47 = arith.addf %42, %46 : vector<8x256xf32>
    %c0_22 = arith.constant 0 : index
    %c0_23 = arith.constant 0 : index
    %48 = vector.load %arg3[%c0_22, %c0_23] : memref<8x1xf32, #tpu.memory_space<vmem>>, vector<8x1xf32>
    %49 = vector.broadcast %48 : vector<8x1xf32> to vector<8x256xf32>
    %50 = arith.mulf %47, %49 : vector<8x256xf32>
    %c0_24 = arith.constant 0 : index
    %c0_25 = arith.constant 0 : index
    %51 = vector.load %arg4[%c0_24, %c0_25] : memref<8x1xf32, #tpu.memory_space<vmem>>, vector<8x1xf32>
    %52 = vector.broadcast %51 : vector<8x1xf32> to vector<8x256xf32>
    %53 = arith.addf %50, %52 : vector<8x256xf32>
    %54 = math.roundeven %53 : vector<8x256xf32>
    %cst_26 = arith.constant 0.000000e+00 : f32
    %cst_27 = arith.constant 2.550000e+02 : f32
    %55 = vector.broadcast %cst_26 : f32 to vector<8x256xf32>
    %56 = arith.maximumf %55, %54 : vector<8x256xf32>
    %57 = vector.broadcast %cst_27 : f32 to vector<8x256xf32>
    %58 = arith.minimumf %57, %56 : vector<8x256xf32>
    %cst_28 = arith.constant 0.000000e+00 : f32
    %59 = vector.broadcast %cst_28 : f32 to vector<8x256xf32>
    %c3_i32 = arith.constant 3 : i32
    %60 = tpu.dynamic_rotate %58 by %c3_i32 dim 0 : vector<8x256xf32>, i32 -> vector<8x256xf32>
    %c0_29 = arith.constant 0 : index
    %c0_30 = arith.constant 0 : index
    %c0_31 = arith.constant 0 : index
    %61 = vector.load %arg5[%c0_29, %c0_30, %c0_31] : memref<7x8x1xf32, #tpu.memory_space<vmem>>, vector<1x8x1xf32>
    %62 = vector.shape_cast %61 : vector<1x8x1xf32> to vector<8x1xf32>
    %63 = vector.broadcast %62 : vector<8x1xf32> to vector<8x256xf32>
    %64 = arith.mulf %60, %63 : vector<8x256xf32>
    %65 = arith.addf %59, %64 : vector<8x256xf32>
    %c2_i32 = arith.constant 2 : i32
    %66 = tpu.dynamic_rotate %58 by %c2_i32 dim 0 : vector<8x256xf32>, i32 -> vector<8x256xf32>
    %c1_32 = arith.constant 1 : index
    %c0_33 = arith.constant 0 : index
    %c0_34 = arith.constant 0 : index
    %67 = vector.load %arg5[%c1_32, %c0_33, %c0_34] : memref<7x8x1xf32, #tpu.memory_space<vmem>>, vector<1x8x1xf32>
    %68 = vector.shape_cast %67 : vector<1x8x1xf32> to vector<8x1xf32>
    %69 = vector.broadcast %68 : vector<8x1xf32> to vector<8x256xf32>
    %70 = arith.mulf %66, %69 : vector<8x256xf32>
    %71 = arith.addf %65, %70 : vector<8x256xf32>
    %c1_i32_35 = arith.constant 1 : i32
    %72 = tpu.dynamic_rotate %58 by %c1_i32_35 dim 0 : vector<8x256xf32>, i32 -> vector<8x256xf32>
    %c2_36 = arith.constant 2 : index
    %c0_37 = arith.constant 0 : index
    %c0_38 = arith.constant 0 : index
    %73 = vector.load %arg5[%c2_36, %c0_37, %c0_38] : memref<7x8x1xf32, #tpu.memory_space<vmem>>, vector<1x8x1xf32>
    %74 = vector.shape_cast %73 : vector<1x8x1xf32> to vector<8x1xf32>
    %75 = vector.broadcast %74 : vector<8x1xf32> to vector<8x256xf32>
    %76 = arith.mulf %72, %75 : vector<8x256xf32>
    %77 = arith.addf %71, %76 : vector<8x256xf32>
    %c3_39 = arith.constant 3 : index
    %c0_40 = arith.constant 0 : index
    %c0_41 = arith.constant 0 : index
    %78 = vector.load %arg5[%c3_39, %c0_40, %c0_41] : memref<7x8x1xf32, #tpu.memory_space<vmem>>, vector<1x8x1xf32>
    %79 = vector.shape_cast %78 : vector<1x8x1xf32> to vector<8x1xf32>
    %80 = vector.broadcast %79 : vector<8x1xf32> to vector<8x256xf32>
    %81 = arith.mulf %58, %80 : vector<8x256xf32>
    %82 = arith.addf %77, %81 : vector<8x256xf32>
    %c7_i32 = arith.constant 7 : i32
    %83 = tpu.dynamic_rotate %58 by %c7_i32 dim 0 : vector<8x256xf32>, i32 -> vector<8x256xf32>
    %c4_42 = arith.constant 4 : index
    %c0_43 = arith.constant 0 : index
    %c0_44 = arith.constant 0 : index
    %84 = vector.load %arg5[%c4_42, %c0_43, %c0_44] : memref<7x8x1xf32, #tpu.memory_space<vmem>>, vector<1x8x1xf32>
    %85 = vector.shape_cast %84 : vector<1x8x1xf32> to vector<8x1xf32>
    %86 = vector.broadcast %85 : vector<8x1xf32> to vector<8x256xf32>
    %87 = arith.mulf %83, %86 : vector<8x256xf32>
    %88 = arith.addf %82, %87 : vector<8x256xf32>
    %c6_i32 = arith.constant 6 : i32
    %89 = tpu.dynamic_rotate %58 by %c6_i32 dim 0 : vector<8x256xf32>, i32 -> vector<8x256xf32>
    %c5_45 = arith.constant 5 : index
    %c0_46 = arith.constant 0 : index
    %c0_47 = arith.constant 0 : index
    %90 = vector.load %arg5[%c5_45, %c0_46, %c0_47] : memref<7x8x1xf32, #tpu.memory_space<vmem>>, vector<1x8x1xf32>
    %91 = vector.shape_cast %90 : vector<1x8x1xf32> to vector<8x1xf32>
    %92 = vector.broadcast %91 : vector<8x1xf32> to vector<8x256xf32>
    %93 = arith.mulf %89, %92 : vector<8x256xf32>
    %94 = arith.addf %88, %93 : vector<8x256xf32>
    %c5_i32 = arith.constant 5 : i32
    %95 = tpu.dynamic_rotate %58 by %c5_i32 dim 0 : vector<8x256xf32>, i32 -> vector<8x256xf32>
    %c6_48 = arith.constant 6 : index
    %c0_49 = arith.constant 0 : index
    %c0_50 = arith.constant 0 : index
    %96 = vector.load %arg5[%c6_48, %c0_49, %c0_50] : memref<7x8x1xf32, #tpu.memory_space<vmem>>, vector<1x8x1xf32>
    %97 = vector.shape_cast %96 : vector<1x8x1xf32> to vector<8x1xf32>
    %98 = vector.broadcast %97 : vector<8x1xf32> to vector<8x256xf32>
    %99 = arith.mulf %95, %98 : vector<8x256xf32>
    %100 = arith.addf %94, %99 : vector<8x256xf32>
    %c0_51 = arith.constant 0 : index
    %c0_52 = arith.constant 0 : index
    %101 = vector.load %arg6[%c0_51, %c0_52] : memref<8x1xf32, #tpu.memory_space<vmem>>, vector<8x1xf32>
    %102 = vector.broadcast %101 : vector<8x1xf32> to vector<8x256xf32>
    %103 = arith.addf %100, %102 : vector<8x256xf32>
    %104 = math.roundeven %103 : vector<8x256xf32>
    %cst_53 = arith.constant -1.280000e+02 : f32
    %cst_54 = arith.constant 1.270000e+02 : f32
    %105 = vector.broadcast %cst_53 : f32 to vector<8x256xf32>
    %106 = arith.maximumf %105, %104 : vector<8x256xf32>
    %107 = vector.broadcast %cst_54 : f32 to vector<8x256xf32>
    %108 = arith.minimumf %107, %106 : vector<8x256xf32>
    %109 = vector.broadcast %0 : f32 to vector<8x256xf32>
    %110 = arith.mulf %2, %109 : vector<8x256xf32>
    %111 = math.roundeven %110 : vector<8x256xf32>
    %cst_55 = arith.constant -1.280000e+02 : f32
    %cst_56 = arith.constant 1.270000e+02 : f32
    %112 = vector.broadcast %cst_55 : f32 to vector<8x256xf32>
    %113 = arith.maximumf %112, %111 : vector<8x256xf32>
    %114 = vector.broadcast %cst_56 : f32 to vector<8x256xf32>
    %115 = arith.minimumf %114, %113 : vector<8x256xf32>
    %116 = arith.addf %115, %108 : vector<8x256xf32>
    %117 = vector.broadcast %1 : f32 to vector<8x256xf32>
    %118 = arith.mulf %116, %117 : vector<8x256xf32>
    %c0_57 = arith.constant 0 : index
    %c0_58 = arith.constant 0 : index
    %119 = vector.load %arg8[%c0_57, %c0_58] : memref<8x256xf32, #tpu.memory_space<vmem>>, vector<8x256xf32>
    tpu.vector_store %arg8[%c0_57, %c0_58], %118 {strides = array<i32>} : memref<8x256xf32, #tpu.memory_space<vmem>>, vector<8x256xf32>,
    return
  }
  func.func @transform_0(%arg0: i32) -> (i32, i32) {
    %c0_i32 = arith.constant 0 : i32
    %c0_i32_0 = arith.constant 0 : i32
    %c0_i32_1 = arith.constant 0 : i32
    return %c0_i32, %c0_i32_0 : i32, i32
  }
  func.func @transform_1(%arg0: i32) -> (i32, i32, i32) {
    %c0_i32 = arith.constant 0 : i32
    %c0_i32_0 = arith.constant 0 : i32
    %c0_i32_1 = arith.constant 0 : i32
    %c0_i32_2 = arith.constant 0 : i32
    return %c0_i32, %c0_i32_0, %c0_i32_1 : i32, i32, i32
  }
  func.func @transform_2(%arg0: i32) -> (i32, i32) {
    %c0_i32 = arith.constant 0 : i32
    %c0_i32_0 = arith.constant 0 : i32
    %c0_i32_1 = arith.constant 0 : i32
    return %c0_i32, %c0_i32_0 : i32, i32
  }
  func.func @transform_3(%arg0: i32) -> (i32, i32) {
    %c0_i32 = arith.constant 0 : i32
    %c0_i32_0 = arith.constant 0 : i32
    %c0_i32_1 = arith.constant 0 : i32
    return %c0_i32, %c0_i32_0 : i32, i32
  }
  func.func @transform_4(%arg0: i32) -> (i32, i32, i32) {
    %c0_i32 = arith.constant 0 : i32
    %c0_i32_0 = arith.constant 0 : i32
    %c0_i32_1 = arith.constant 0 : i32
    %c0_i32_2 = arith.constant 0 : i32
    return %c0_i32, %c0_i32_0, %c0_i32_1 : i32, i32, i32
  }
  func.func @transform_5(%arg0: i32) -> (i32, i32) {
    %c0_i32 = arith.constant 0 : i32
    %c0_i32_0 = arith.constant 0 : i32
    %c0_i32_1 = arith.constant 0 : i32
    return %c0_i32, %c0_i32_0 : i32, i32
  }
  func.func @transform_6(%arg0: i32) -> i32 {
    %c0_i32 = arith.constant 0 : i32
    %c0_i32_0 = arith.constant 0 : i32
    return %c0_i32 : i32
  }
  func.func @transform_7(%arg0: i32) -> (i32, i32) {
    %c0_i32 = arith.constant 0 : i32
    %c0_i32_0 = arith.constant 0 : i32
    %c0_i32_1 = arith.constant 0 : i32
    return %c0_i32, %c0_i32_0 : i32, i32
  }
}

</mosaic_0001>

<bundles_post_ra>
// kernel: tpu_custom_call.1
= control target key start
LH: loop header
LB: loop body
LE: loop exit
PB: predicated region body
PF: predicated region fallthrough
CT: control target
= control target key end

     0   :  { %12 = vsyncpa [#allocation3], 0  ;;  %s577_s0 = inlined_call_operand.vmem [shape: f32[8,256], index: 0, kind: input, shape index: {}]   ;;  %s578_s1 = inlined_call_operand.hbm [shape: f32[9,8,256], index: 1, kind: input, shape index: {}]   ;;  %s579_s2 = inlined_call_operand.vmem [shape: f32[8,1], index: 2, kind: input, shape index: {}]   ;;  %s580_s3 = inlined_call_operand.vmem [shape: f32[8,1], index: 3, kind: input, shape index: {}]   ;;  %s581_s4 = inlined_call_operand.vmem [shape: f32[7,8,1], index: 4, kind: input, shape index: {}]   ;;  %s582_s5 = inlined_call_operand.vmem [shape: f32[8,1], index: 5, kind: input, shape index: {}]   ;;  %s583_s6 = inlined_call_operand.vmem [shape: f32[2], index: 6, kind: input, shape index: {}]   ;;  %s584_s7 = inlined_call_operand.hbm [shape: f32[8,256], index: 7, kind: output, shape index: {}]  }
   0x1   :  { %13 = vsyncpa [#allocation5], 0 }
   0x2   :  { %14 = vsyncpa [#allocation4], 0  ;;  %s424_s24 = smov [#allocation2]   ;;  %s43_s28 = sshll.u32 %s583_s6, 4  ;;  %s44_s28 = int_to_ptr.vmem [resolvable:$true] %s43_s28 }
   0x3   :  { %s22_s25 = sshll.u32 %s424_s24, 4  ;;  %s362_s8 = scalar_lea.hbm %s578_s1, 2304  ;;  %s23_s25 = int_to_ptr.vmem [resolvable:$true] %s22_s25 }
   0x4   :  { %p363_p0 = scmp.ne.s32.totalorder %s578_s1, %s362_s8  ;;  %p366_p1 = scmp.lt.u32.totalorder %s362_s8, %s578_s1 }
   0x6   :  { %p368_p2 = pnand %p366_p1, %p363_p0 }
   0x8   :  { %371 = shalt.err (!%p368_p2)
}
   0x9   :  { %s372_s13 = scalar_lea.vmem %s23_s25, 2304  ;;  %p377_p4 = scmp.lt.s32.totalorder %s23_s25, %s23_s25 }
   0xa   :  { %p373_p3 = scmp.ne.s32.totalorder %s23_s25, %s372_s13  ;;  %p378_p5 = scmp.lt.s32.totalorder %s372_s13, %s372_s13 }
   0xc   :  { %p379_p6 = por %p378_p5, %p377_p4 }
   0xe   :  { %p380_p7 = pnand %p379_p6, %p373_p3 }
  0x10   :  { %383 = shalt.err (!%p380_p7)
}
  0x11   :  { %s425_s6 = smov 256   ;;  %s426_s14 = smov 16  }
  0x12   :  { %28 = dma.hbm_to_vmem [thread:$0]  %s578_s1, 2304, %s23_s25, [#allocation3], %s425_s6, %s425_s6, %s426_s14  }
  0x13   :  { %s384_s17 = scalar_lea.vmem %s44_s28, 16  ;;  %p389_p9 = scmp.lt.s32.totalorder %s44_s28, %s44_s28 }
  0x14   :  { %p385_p8 = scmp.ne.s32.totalorder %s44_s28, %s384_s17  ;;  %p390_p10 = scmp.lt.s32.totalorder %s384_s17, %s384_s17 }
  0x16   :  { %p391_p11 = por %p390_p10, %p389_p9 }
  0x18   :  { %p392_p12 = pnand %p391_p11, %p385_p8 }
  0x1a   :  { %395 = shalt.err (!%p392_p12)
}
  0x1b   :  { %s427_s18 = smov [#allocation6]  }
  0x1c   :  { %46 = dma.vmem_to_smem %s44_s28, 16, %s427_s18, [#allocation5]  }
  0x1d   :  { %418 = dma.done.wait [#allocation3], 2304  }
  0x1e   :  { %419 = vsyncadd [#allocation3], 4294964992 }
  0x1f   :  { %420 = dma.done.wait [#allocation5], 16  }
  0x20   :  { %421 = vsyncadd [#allocation5], 4294967280 }
  0x21   :  { %53 = sfence }
  0x22   :  { %v495_v0 = vld [vmem:[%s577_s0] sm:$0xff]  ;;  %s428_s1 = smov 17   ;;  %v502_v1 = vld [vmem:[%s577_s0 + $0x8] sm:$0xff]  ;;  %v429_v2 = vmov 0   ;;  %s430_s23 = smov 15   ;;  %v336_v7 = vld [vmem:[%s581_s4 + $0x10] sm:$0xff]  ;;  %v62_v17 = vlaneseq }
  0x23   :  { %73 = vrot.lane.b32.xlu1 %v495_v0, %s426_s14  ;;  %58 = vrot.lane.b32.xlu0 %v495_v0, %s428_s1  ;;  %s431_s24 = smov 1   ;;  %s432_s25 = smov 127   ;;  %v178_v3 = vld [vmem:[%s579_s2] sm:$0xff]  ;;  %v335_v6 = vld [vmem:[%s581_s4 + $0x8] sm:$0xff]  ;;  %v81_v23 = vld [vmem:[#allocation2 + $0x10] sm:$0xff] }
  0x24   :  { %360 = vset.pattern.permute.xlu0 %v429_v2  ;;  %361 = vset.pattern.permute.xlu1 %v429_v2  ;;  %s433_s0 = smov 113   ;;  %s434_s26 = smov 112   ;;  %v186_v4 = vld [vmem:[%s580_s3] sm:$0xff]  ;;  %v337_v8 = vld [vmem:[%s581_s4 + $0x18] sm:$0xff]  ;;  %v339_v10 = vld [vmem:[%s581_s4 + $0x28] sm:$0xff]  ;;  %v548_v20 = vand.u32 127, %v62_v17 }
  0x25   :  { %s435_s29 = smov 111   ;;  %v202_v5 = vld [vmem:[%s581_s4] sm:$0xff]  ;;  %v340_v11 = vld [vmem:[%s581_s4 + $0x30] sm:$0xff]  ;;  %v82_v25 = vld [vmem:[#allocation2 + $0x18] sm:$0xff]  ;;  %s436_s21 = smov [#allocation7]  }
  0x26   :  { %v338_v9 = vld [vmem:[%s581_s4 + $0x20] sm:$0xff]  ;;  %vm77_vm0 = vcmp.lt.s32.totalorder %v548_v20, 16  ;;  %vm64_vm1 = vcmp.lt.s32.totalorder %v548_v20, 17  ;;  %vm91_vm2 = vcmp.lt.s32.totalorder %v548_v20, 15  ;;  %v68_v29 = vld [vmem:[#allocation2 + $0x8] sm:$0xff]  ;;  %vm105_vm3 = vcmp.lt.s32.totalorder %v548_v20, 1 }
  0x27   :  { %75 = vrot.lane.b32.xlu1 %v502_v1, %s426_s14  ;;  %60 = vrot.lane.b32.xlu0 %v502_v1, %s428_s1  ;;  %v288_v12 = vld [vmem:[%s582_s5] sm:$0xff]  ;;  %v96_v34 = vld [vmem:[#allocation2 + $0x28] sm:$0xff]  ;;  %v109_v42 = vld [vmem:[#allocation2 + $0x30] sm:$0xff]  ;;  %vm126_vm4 = vcmp.lt.s32.totalorder %v548_v20, 127  ;;  %vm140_vm5 = vcmp.lt.s32.totalorder %v548_v20, 113  ;;  %vm154_vm6 = vcmp.lt.s32.totalorder %v548_v20, 112 }
  0x28   :  { %v67_v28 = vld [vmem:[#allocation2] sm:$0xff]  ;;  %v110_v43 = vld [vmem:[#allocation2 + $0x38] sm:$0xff]  ;;  %v117_v55 = vld [vmem:[#allocation2 + $0x48] sm:$0xff]  ;;  %vm168_vm7 = vcmp.lt.s32.totalorder %v548_v20, 111  ;;  %s560_s4 = sld [smem:[#allocation6]]  ;;  %s334_s5 = sld [smem:[#allocation6 + $0x1]] }
  0x29   :  { %v95_v33 = vld [vmem:[#allocation2 + $0x20] sm:$0xff]  ;;  %v119_v61 = vmul.f32 %v117_v55, %v502_v1  ;;  %v130_v63 = vld [vmem:[#allocation2 + $0x50] sm:$0xff]  ;;  %v131_v2 = vld [vmem:[#allocation2 + $0x58] sm:$0xff]  ;;  %s324_s22 = sshll.u32 %s436_s21, 4  ;;  %s325_s22 = int_to_ptr.vmem [resolvable:$true] %s324_s22 }
  0x2a   :  { %v116_v52 = vld [vmem:[#allocation2 + $0x40] sm:$0xff]  ;;  %p401_p0 = scmp.lt.s32.totalorder %s325_s22, %s325_s22 }
  0x2b   :  { %89 = vrot.lane.b32.xlu1 %v502_v1, %s430_s23  ;;  %87 = vrot.lane.b32.xlu0 %v495_v0, %s430_s23  ;;  %v118_v58 = vmul.f32 %v116_v52, %v495_v0  ;;  %s396_s23 = scalar_lea.vmem %s325_s22, 256 }
  0x2c   :  { %p397_p13 = scmp.ne.s32.totalorder %s325_s22, %s396_s23  ;;  %p402_p1 = scmp.lt.s32.totalorder %s396_s23, %s396_s23 }
  0x2e   :  { %p403_p2 = por %p402_p1, %p401_p0 }
  0x2f   :  { %103 = vrot.lane.b32.xlu1 %v502_v1, %s431_s24  ;;  %101 = vrot.lane.b32.xlu0 %v495_v0, %s431_s24 }
  0x30   :  { %p404_p3 = pnand %p403_p2, %p397_p13 }
  0x33   :  { %124 = vrot.lane.b32.xlu1 %v502_v1, %s432_s25  ;;  %122 = vrot.lane.b32.xlu0 %v495_v0, %s432_s25 }
  0x37   :  { %138 = vrot.lane.b32.xlu1 %v502_v1, %s433_s0  ;;  %136 = vrot.lane.b32.xlu0 %v495_v0, %s433_s0 }
  0x3b   :  { %152 = vrot.lane.b32.xlu1 %v502_v1, %s434_s26  ;;  %150 = vrot.lane.b32.xlu0 %v495_v0, %s434_s26 }
  0x3f   :  { %164 = vrot.lane.b32.xlu1 %v495_v0, %s435_s29  ;;  %181 = vperm.xlu0 %360, %v178_v3  }
  0x43   :  { %166 = vrot.lane.b32.xlu1 %v502_v1, %s435_s29  ;;  %189 = vperm.xlu0 %360, %v186_v4  }
  0x47   :  { %205 = vperm.xlu1 %361, %v202_v5   ;;  %218 = vperm.xlu0 %360, %v335_v6   ;;  %v144_v6 = vld [vmem:[#allocation2 + $0x60] sm:$0xff] }
  0x4b   :  { %231 = vperm.xlu1 %361, %v336_v7   ;;  %242 = vperm.xlu0 %360, %v337_v8   ;;  %v145_v7 = vld [vmem:[#allocation2 + $0x68] sm:$0xff] }
  0x4f   :  { %255 = vperm.xlu1 %361, %v338_v9   ;;  %268 = vperm.xlu0 %360, %v339_v10  }
  0x53   :  { %281 = vperm.xlu1 %361, %v340_v11   ;;  %291 = vperm.xlu0 %360, %v288_v12  }
  0x95   :  { %v74_v13 = vpop.permute.xlu1 %73  ;;  %v59_v14 = vpop.permute.xlu0 %58 }
  0x99   :  { %v76_v15 = vpop.permute.xlu1 %75  ;;  %v61_v16 = vpop.permute.xlu0 %60 }
  0x9a   :  { %v78_v26 = vsel %vm77_vm0, %v74_v13, %v76_v15  ;;  %v79_v27 = vsel %vm77_vm0, %v76_v15, %v74_v13  ;;  %v65_v30 = vsel %vm64_vm1, %v59_v14, %v61_v16  ;;  %v66_v31 = vsel %vm64_vm1, %v61_v16, %v59_v14  ;;  %v158_v15 = vld [vmem:[#allocation2 + $0x70] sm:$0xff]  ;;  %v159_v16 = vld [vmem:[#allocation2 + $0x78] sm:$0xff] }
  0x9b   :  { %v83_v37 = vmul.f32 %v81_v23, %v79_v27  ;;  %v84_v38 = vmul.f32 %v82_v25, %v78_v26  ;;  %v69_v39 = vmul.f32 %v67_v28, %v66_v31  ;;  %v70_v40 = vmul.f32 %v68_v29, %v65_v30  ;;  %v173_v23 = vld [vmem:[#allocation2 + $0x88] sm:$0xff] }
  0x9d   :  { %v90_v18 = vpop.permute.xlu1 %89  ;;  %v88_v19 = vpop.permute.xlu0 %87  ;;  %v85_v48 = vadd.f32 %v83_v37, %v69_v39  ;;  %v86_v49 = vadd.f32 %v84_v38, %v70_v40 }
  0x9e   :  { %v92_v35 = vsel %vm91_vm2, %v88_v19, %v90_v18  ;;  %v93_v36 = vsel %vm91_vm2, %v90_v18, %v88_v19 }
  0x9f   :  { %v97_v46 = vmul.f32 %v95_v33, %v93_v36  ;;  %v98_v47 = vmul.f32 %v96_v34, %v92_v35 }
  0xa1   :  { %v104_v21 = vpop.permute.xlu1 %103  ;;  %v102_v22 = vpop.permute.xlu0 %101  ;;  %v99_v56 = vadd.f32 %v97_v46, %v85_v48  ;;  %v100_v57 = vadd.f32 %v98_v47, %v86_v49 }
  0xa2   :  { %v106_v44 = vsel %vm105_vm3, %v102_v22, %v104_v21  ;;  %v107_v45 = vsel %vm105_vm3, %v104_v21, %v102_v22  ;;  %v172_v22 = vld [vmem:[#allocation2 + $0x80] sm:$0xff] }
  0xa3   :  { %v111_v50 = vmul.f32 %v109_v42, %v107_v45  ;;  %v112_v51 = vmul.f32 %v110_v43, %v106_v44 }
  0xa5   :  { %v125_v24 = vpop.permute.xlu1 %124  ;;  %v123_v32 = vpop.permute.xlu0 %122  ;;  %v113_v59 = vadd.f32 %v111_v50, %v99_v56  ;;  %v114_v60 = vadd.f32 %v112_v51, %v100_v57 }
  0xa6   :  { %v127_v3 = vsel %vm126_vm4, %v123_v32, %v125_v24  ;;  %v128_v4 = vsel %vm126_vm4, %v125_v24, %v123_v32 }
  0xa7   :  { %v121_v10 = vadd.f32 %v119_v61, %v114_v60  ;;  %v120_v11 = vadd.f32 %v118_v58, %v113_v59  ;;  %v132_v12 = vmul.f32 %v130_v63, %v127_v3  ;;  %v133_v13 = vmul.f32 %v131_v2, %v128_v4 }
  0xa8   :  { %v302_v2 = vstv %s560_s4 }
  0xa9   :  { %v139_v41 = vpop.permute.xlu1 %138  ;;  %v137_v53 = vpop.permute.xlu0 %136  ;;  %v134_v26 = vadd.f32 %v132_v12, %v120_v11  ;;  %v135_v27 = vadd.f32 %v133_v13, %v121_v10 }
  0xaa   :  { %v141_v8 = vsel %vm140_vm5, %v137_v53, %v139_v41  ;;  %v142_v9 = vsel %vm140_vm5, %v139_v41, %v137_v53 }
  0xab   :  { %v146_v19 = vmul.f32 %v144_v6, %v141_v8  ;;  %v147_v21 = vmul.f32 %v145_v7, %v142_v9 }
  0xad   :  { %v153_v54 = vpop.permute.xlu1 %152  ;;  %v151_v5 = vpop.permute.xlu0 %150  ;;  %v148_v20 = vadd.f32 %v146_v19, %v134_v26  ;;  %v149_v30 = vadd.f32 %v147_v21, %v135_v27 }
  0xae   :  { %v155_v17 = vsel %vm154_vm6, %v151_v5, %v153_v54  ;;  %v156_v18 = vsel %vm154_vm6, %v153_v54, %v151_v5 }
  0xaf   :  { %v160_v28 = vmul.f32 %v158_v15, %v155_v17  ;;  %v161_v29 = vmul.f32 %v159_v16, %v156_v18  ;;  %v303_v16 = vmul.f32 %v302_v2, %v495_v0  ;;  %v304_v17 = vmul.f32 %v302_v2, %v502_v1 }
  0xb1   :  { %v165_v62 = vpop.permute.xlu1 %164  ;;  %v162_v33 = vadd.f32 %v160_v28, %v148_v20  ;;  %v163_v34 = vadd.f32 %v161_v29, %v149_v30  ;;  %v345_v20 = vround.rtne.f32 %v303_v16  ;;  %v346_v30 = vround.rtne.f32 %v304_v17 }
  0xb5   :  { %v167_v14 = vpop.permute.xlu1 %166 }
  0xb6   :  { %v169_v24 = vsel %vm168_vm7, %v165_v62, %v167_v14  ;;  %v170_v25 = vsel %vm168_vm7, %v167_v14, %v165_v62 }
  0xb7   :  { %v174_v31 = vmul.f32 %v172_v22, %v169_v24  ;;  %v175_v32 = vmul.f32 %v173_v23, %v170_v25 }
  0xb9   :  { %v177_v36 = vadd.f32 %v175_v32, %v163_v34  ;;  %v176_v37 = vadd.f32 %v174_v31, %v162_v33 }
  0xbe   :  { %v182_v35 = vpop.permute.xlu0 %181 }
  0xbf   :  { %v184_v38 = vmul.f32 %v182_v35, %v176_v37  ;;  %v185_v39 = vmul.f32 %v182_v35, %v177_v36 }
  0xc2   :  { %v190_v40 = vpop.permute.xlu0 %189 }
  0xc3   :  { %v192_v41 = vadd.f32 %v190_v40, %v184_v38  ;;  %v193_v42 = vadd.f32 %v190_v40, %v185_v39  ;;  %v307_v38 = vmax.f32 %v345_v20, -128.0  ;;  %v308_v39 = vmax.f32 %v346_v30, -128.0 }
  0xc5   :  { %v341_v43 = vround.rtne.f32 %v192_v41  ;;  %v342_v44 = vround.rtne.f32 %v193_v42 }
  0xc6   :  { %v206_v45 = vpop.permute.xlu1 %205  ;;  %v219_v46 = vpop.permute.xlu0 %218 }
  0xc7   :  { %v196_v47 = vmax.f32 %v341_v43, 0.0  ;;  %v197_v48 = vmax.f32 %v342_v44, 0.0  ;;  %v309_v44 = vmin.f32 %v307_v38, 127.0 }
  0xc9   :  { %v198_v49 = vmin.f32 %v196_v47, 255.0  ;;  %v199_v50 = vmin.f32 %v197_v48, 255.0  ;;  %v313_v48 = vstv %s334_s5 }
  0xca   :  { %v232_v51 = vpop.permute.xlu1 %231  ;;  %v243_v58 = vpop.permute.xlu0 %242 }
  0xcb   :  { %v200_v52 = vrot.slane %v198_v49, 5  ;;  %v201_v53 = vrot.slane %v199_v50, 5  ;;  %v213_v54 = vrot.slane %v199_v50, 6  ;;  %v212_v55 = vrot.slane %v198_v49, 6 }
  0xcc   :  { %v225_v56 = vrot.slane %v198_v49, 7  ;;  %v226_v57 = vrot.slane %v199_v50, 7  ;;  %v245_v7 = vmul.f32 %v243_v58, %v198_v49  ;;  %v246_v8 = vmul.f32 %v243_v58, %v199_v50 }
  0xcd   :  { %v208_v59 = vmul.f32 %v206_v45, %v200_v52  ;;  %v209_v60 = vmul.f32 %v206_v45, %v201_v53  ;;  %v221_v61 = vmul.f32 %v219_v46, %v212_v55  ;;  %v222_v62 = vmul.f32 %v219_v46, %v213_v54 }
  0xce   :  { %v256_v63 = vpop.permute.xlu1 %255  ;;  %v234_v5 = vmul.f32 %v232_v51, %v225_v56  ;;  %v235_v6 = vmul.f32 %v232_v51, %v226_v57  ;;  %v249_v11 = vrot.slane %v198_v49, 1  ;;  %v250_v12 = vrot.slane %v199_v50, 1  ;;  %v269_v14 = vpop.permute.xlu0 %268 }
  0xcf   :  { %v223_v3 = vadd.f32 %v221_v61, %v208_v59  ;;  %v224_v4 = vadd.f32 %v222_v62, %v209_v60  ;;  %v263_v13 = vrot.slane %v199_v50, 2  ;;  %v262_v15 = vrot.slane %v198_v49, 2 }
  0xd0   :  { %v258_v21 = vmul.f32 %v256_v63, %v249_v11  ;;  %v259_v22 = vmul.f32 %v256_v63, %v250_v12  ;;  %v275_v24 = vrot.slane %v198_v49, 3  ;;  %v276_v25 = vrot.slane %v199_v50, 3 }
  0xd1   :  { %v236_v9 = vadd.f32 %v234_v5, %v223_v3  ;;  %v237_v10 = vadd.f32 %v235_v6, %v224_v4  ;;  %v271_v28 = vmul.f32 %v269_v14, %v262_v15  ;;  %v272_v29 = vmul.f32 %v269_v14, %v263_v13 }
  0xd2   :  { %v282_v23 = vpop.permute.xlu1 %281  ;;  %v292_v1 = vpop.permute.xlu0 %291  ;;  %v310_v45 = vmin.f32 %v308_v39, 127.0 }
  0xd3   :  { %v247_v18 = vadd.f32 %v245_v7, %v236_v9  ;;  %v248_v19 = vadd.f32 %v246_v8, %v237_v10  ;;  %v284_v33 = vmul.f32 %v282_v23, %v275_v24  ;;  %v285_v34 = vmul.f32 %v282_v23, %v276_v25 }
  0xd5   :  { %v260_v26 = vadd.f32 %v258_v21, %v247_v18  ;;  %v261_v27 = vadd.f32 %v259_v22, %v248_v19 }
  0xd7   :  { %v273_v31 = vadd.f32 %v271_v28, %v260_v26  ;;  %v274_v32 = vadd.f32 %v272_v29, %v261_v27 }
  0xd9   :  { %v287_v0 = vadd.f32 %v285_v34, %v274_v32  ;;  %v286_v35 = vadd.f32 %v284_v33, %v273_v31 }
  0xdb   :  { %v294_v36 = vadd.f32 %v292_v1, %v286_v35  ;;  %v295_v37 = vadd.f32 %v292_v1, %v287_v0 }
  0xdd   :  { %v343_v40 = vround.rtne.f32 %v294_v36  ;;  %v344_v41 = vround.rtne.f32 %v295_v37 }
  0xdf   :  { %v298_v42 = vmax.f32 %v343_v40, -128.0  ;;  %v299_v43 = vmax.f32 %v344_v41, -128.0 }
  0xe1   :  { %v300_v46 = vmin.f32 %v298_v42, 127.0  ;;  %v301_v47 = vmin.f32 %v299_v43, 127.0 }
  0xe3   :  { %v311_v49 = vadd.f32 %v309_v44, %v300_v46  ;;  %v312_v50 = vadd.f32 %v310_v45, %v301_v47 }
  0xe5   :  { %v314_v51 = vmul.f32 %v313_v48, %v311_v49  ;;  %v315_v52 = vmul.f32 %v313_v48, %v312_v50 }
  0xe7   :  { %316 = vst [vmem:[#allocation7] sm:$0xff] %v314_v51  ;;  %317 = vst [vmem:[#allocation7 + $0x8] sm:$0xff] %v315_v52 }
  0xe8   :  { %407 = shalt.err (!%p404_p3)
}
  0xe9   :  { %s408_s0 = scalar_lea.hbm %s584_s7, 256 }
  0xea   :  { %p409_p4 = scmp.ne.s32.totalorder %s584_s7, %s408_s0  ;;  %p412_p5 = scmp.lt.u32.totalorder %s408_s0, %s584_s7 }
  0xec   :  { %p414_p6 = pnand %p412_p5, %p409_p4 }
  0xee   :  { %417 = shalt.err (!%p414_p6)
}
  0xef   :  { %327 = dma.vmem_to_hbm [thread:$0]  %s325_s22, 256, %s584_s7, [#allocation4]  }
  0xf0   :  { %422 = dma.done.wait [#allocation4], 256  }
  0xf1   :  { %423 = vsyncadd [#allocation4], 4294967040 }
  0xf2   :  { %331 = vsyncpa [#allocation3], 1 }
  0xf3   :  { %332 = vsyncpa [#allocation4], 1 }
  0xf4   :  { %333 = vsyncpa [#allocation5], 1 }

</bundles_post_ra>
